<compile_context>
chip_gen: v6e
topology: v6e:2x2x1
jax: 0.10.0
libtpu: 0.0.40
codegen_flags: <defaults>
</compile_context>

<pallas_src>
import numpy as np
import jax
import jax.numpy as jnp
from jax import lax
from jax.experimental import pallas as pl
from jax.experimental.pallas import tpu as pltpu


# ------------------------------ configuration --------------------------------

CIN = 3                    # Relation default channels=3
CIN_PAD = 16               # layer-1 input channels padded so bf16 im2col chunks are tile-aligned
H_IN = W_IN = 16           # small demo spatial size
C1, C2, C3 = 16, 32, 64    # scaled-down VGG channel widths
DDIM = 128                 # model_bn2 Linear width (stand-in)
ZDIM = 128                 # mu latent width (DISC_SIZE = 128)

H_B = W_B = H_IN // 2      # after pool1 -> 8
H_C = W_C = H_B // 2       # after pool2 -> 4
H_D = W_D = H_C // 2       # after pool3 -> 2
S_LAST = H_D * W_D         # 4 spatial positions feeding the Linear


def _npad(h, w):           # per-image padded-flat length, rounded up to a 128-lane multiple
    return ((h + 2) * (w + 2) + 127) // 128 * 128


WP_A, N_A, NPAD_A = W_IN + 2, (H_IN + 2) * (W_IN + 2), _npad(H_IN, W_IN)   # 18, 324, 384
WP_B, N_B, NPAD_B = W_B + 2, (H_B + 2) * (W_B + 2), _npad(H_B, W_B)        # 10, 100, 128
WP_C, N_C, NPAD_C = W_C + 2, (H_C + 2) * (W_C + 2), _npad(H_C, W_C)        # 6,  36, 128


# --------------------------- roll-direction probe ------------------------------

_ROLL_SIGN = None


def _roll_sign():
    """Return s such that pltpu.roll(a, (s*off) % n, axis=1)[:, q] == a[:, (q+off) % n]."""
    global _ROLL_SIGN
    if _ROLL_SIGN is None:
        def probe(x_ref, o_ref):
            o_ref[...] = pltpu.roll(x_ref[...], shift=1, axis=1)

        x = jnp.broadcast_to(lax.iota(jnp.float32, 128)[None, :], (8, 128))
        y = pl.pallas_call(probe, out_shape=jax.ShapeDtypeStruct((8, 128), jnp.float32))(x)
        _ROLL_SIGN = 1 if int(y[0, 0]) == 1 else -1     # jnp.roll convention -> -1
    return _ROLL_SIGN


# --------------------------------- kernel -------------------------------------

def _make_kernel(nimg, bblk, roll_sign):
    """Kernel processing 2*bblk images (bblk (x1, x2) pairs) laid side-by-side on lanes."""
    LA, LB, LC = nimg * NPAD_A, nimg * NPAD_B, nimg * NPAD_C

    def shift(a, off, width):
        # result[:, q] = a[:, (q + off) % width]; wrapped lanes only land in pad / border
        # columns, which are masked or never read by pool anchors.
        if off == 0:
            return a
        return pltpu.roll(a, shift=(roll_sign * off) % width, axis=1)

    def conv3x3(a, w_ref, b_ref, wp, width):
        # One im2col MXU matmul per conv: [Cout, 9*Cin] @ [9*Cin, width].
        a = a.astype(jnp.bfloat16)                      # halve patch-buffer traffic
        patches = jnp.concatenate(
            [shift(a, dy * wp + dx, width) for dy in (-1, 0, 1) for dx in (-1, 0, 1)],
            axis=0)
        return jnp.dot(w_ref[...], patches, preferred_element_type=jnp.float32) + b_ref[...]

    def maxpool2(a, wp, width, s_ref):
        # 2x2 / stride-2 window max on the VPU (two XLU rolls + max); the stride-2 subsample
        # and zero re-pad of the pooled image are fused into one 0/1 selection matmul.
        m = jnp.maximum(a, shift(a, 1, width))
        m = jnp.maximum(m, shift(m, wp, width))
        return jnp.dot(m.astype(jnp.bfloat16), s_ref[...], preferred_element_type=jnp.float32)

    def kernel(x_ref, w1, b1, w2, b2, w3, b3, w4, b4, w5, b5,
               ma, mb, s1, s2, s3, wfc, bfc, wmu, bmu, o_ref):
        x = x_ref[0]                                   # [CIN_PAD, LA] bf16, nimg images on lanes
        # ---- model_bn1 (VGG16 features[:10] structure; weights shared by both branches) ----
        h = jnp.maximum(conv3x3(x, w1, b1, WP_A, LA), 0.0) * ma[...]
        h = jnp.maximum(conv3x3(h, w2, b2, WP_A, LA), 0.0)
        h = maxpool2(h, WP_A, LA, s1)                  # [C1, LB]
        h = jnp.maximum(conv3x3(h, w3, b3, WP_B, LB), 0.0) * mb[...]
        h = jnp.maximum(conv3x3(h, w4, b4, WP_B, LB), 0.0)
        h = maxpool2(h, WP_B, LB, s2)                  # [C2, LC]
        # ---- model_bn_share (stand-in: conv3x3 + ReLU + maxpool) ----
        h = jnp.maximum(conv3x3(h, w5, b5, WP_C, LC), 0.0)
        feat = maxpool2(h, WP_C, LC, s3)               # [C3, S_LAST*nimg], lane = s*nimg + img
        # ---- model_bn2: ONE Linear matmul over the PyTorch c-major flatten, + ReLU ----
        fcpre = jnp.concatenate(
            [feat[:, s * nimg:(s + 1) * nimg] for s in range(S_LAST)],
            axis=0).astype(jnp.bfloat16)               # [S_LAST*C3, nimg]
        fc = jnp.maximum(
            jnp.dot(wfc[...], fcpre, preferred_element_type=jnp.float32) + bfc[...], 0.0)
        # ---- mu: 1x1 conv on (B, D, 1, 1) == Linear D -> Z ----
        g = jnp.dot(wmu[...], fc.astype(jnp.bfloat16),
                    preferred_element_type=jnp.float32) + bmu[...]        # [ZDIM, nimg]
        # ---- ((g1 - g2) ** 2): exact f32 pair differences, lane-dense store ----
        gt = jnp.transpose(g)                          # [nimg, ZDIM]
        rows = [gt[2 * p:2 * p + 1, :] - gt[2 * p + 1:2 * p + 2, :] for p in range(bblk)]
        d = rows[0] if bblk == 1 else jnp.concatenate(rows, axis=0)       # [bblk, ZDIM]
        o_ref[0] = (d * d).astype(o_ref.dtype)

    return kernel


# ------------------------------ host-side helpers ------------------------------

def _interior_mask_np(h, w, npad, nimg):
    """1.0 on interior pixels of each image's padded-flat block, 0.0 elsewhere."""
    wp = w + 2
    m = np.zeros((npad,), np.float32)
    for y in range(1, h + 1):
        m[y * wp + 1: y * wp + 1 + w] = 1.0
    return np.tile(m, nimg)[None, :]


def _pool_select_np(h_in, w_in, npad_in, npad_out, nimg):
    """0/1 block-diagonal matrix: window-maxed padded-flat layer -> stride-2 subsampled,
    zero-bordered padded-flat next layer (subsample + re-pad fused into one matmul)."""
    wp_i, ho, wo = w_in + 2, h_in // 2, w_in // 2
    wp_o = wo + 2
    S = np.zeros((nimg * npad_in, nimg * npad_out), np.float32)
    for m in range(nimg):
        for i in range(ho):
            for j in range(wo):
                S[m * npad_in + (2 * i + 1) * wp_i + (2 * j + 1),
                  m * npad_out + (i + 1) * wp_o + (j + 1)] = 1.0
    return S


def _pool_select_last_np(h_in, w_in, npad_in, nimg):
    """Final pool: unpadded output, lane = spatial_index*nimg + image (s-major), so the FC
    im2col is just contiguous lane slices."""
    wp_i, ho, wo = w_in + 2, h_in // 2, w_in // 2
    S = np.zeros((nimg * npad_in, ho * wo * nimg), np.float32)
    for m in range(nimg):
        for i in range(ho):
            for j in range(wo):
                S[m * npad_in + (2 * i + 1) * wp_i + (2 * j + 1),
                  (i * wo + j) * nimg + m] = 1.0
    return S


def init_params(key):
    """PyTorch-layout parameters (OIHW convs, [out, in] Linears), deterministic."""
    ks = jax.random.split(key, 14)

    def conv(k, cout, cin):
        return jax.random.normal(k, (cout, cin, 3, 3), jnp.float32) / np.sqrt(9.0 * cin)

    def vec(k, n):
        return jax.random.normal(k, (n,), jnp.float32) * 0.1

    return {
        "w1": conv(ks[0], C1, CIN), "b1": vec(ks[1], C1),
        "w2": conv(ks[2], C1, C1),  "b2": vec(ks[3], C1),
        "w3": conv(ks[4], C2, C1),  "b3": vec(ks[5], C2),
        "w4": conv(ks[6], C2, C2),  "b4": vec(ks[7], C2),
        "w5": conv(ks[8], C3, C2),  "b5": vec(ks[9], C3),
        "wfc": jax.random.normal(ks[10], (DDIM, C3 * S_LAST), jnp.float32)
               / np.sqrt(C3 * S_LAST),
        "bfc": vec(ks[11], DDIM),
        "wmu": jax.random.normal(ks[12], (ZDIM, DDIM), jnp.float32) / np.sqrt(DDIM),
        "bmu": vec(ks[13], ZDIM),
    }


def _kernel_weights(p):
    """PyTorch-layout weights -> MXU-friendly bf16 layouts (done once on the host)."""
    def cw(w, cin_pad=None):   # OIHW -> [O, 9*Cin_pad], column (ky*3+kx)*Cin_pad + ci
        o, i = w.shape[0], w.shape[1]
        wt = jnp.transpose(w, (0, 2, 3, 1))
        if cin_pad is not None and cin_pad > i:
            wt = jnp.pad(wt, ((0, 0), (0, 0), (0, 0), (0, cin_pad - i)))
            i = cin_pad
        return wt.reshape(o, 9 * i).astype(jnp.bfloat16)

    def cb(b):
        return b.reshape(-1, 1).astype(jnp.float32)

    # Linear weight [D, C3*S] (torch col index c*S + s) -> [D, S*C3] (col index s*C3 + c)
    wfc = jnp.transpose(p["wfc"].reshape(DDIM, C3, S_LAST), (0, 2, 1)).reshape(DDIM, S_LAST * C3)
    return {
        "w1": cw(p["w1"], CIN_PAD), "b1": cb(p["b1"]),
        "w2": cw(p["w2"]), "b2": cb(p["b2"]),
        "w3": cw(p["w3"]), "b3": cb(p["b3"]),
        "w4": cw(p["w4"]), "b4": cb(p["b4"]),
        "w5": cw(p["w5"]), "b5": cb(p["b5"]),
        "wfc": wfc.astype(jnp.bfloat16), "bfc": cb(p["bfc"]),
        "wmu": p["wmu"].astype(jnp.bfloat16), "bmu": cb(p["bmu"]),
    }


def _choose_bblk(batch):
    """Pairs per grid step: batch-fuse as much as possible while keeping an even grid
    (both v7x TensorCores busy) when the batch allows it."""
    for bb in (4, 3, 2, 1):
        if batch % bb == 0 and (batch // bb) % 2 == 0:
            return bb
    for bb in (4, 3, 2, 1):
        if batch % bb == 0:
            return bb
    return 1


def make_relation_forward(params, batch):
    """Build Relation.forward(x1, x2) for a fixed batch: all constants are prepared once."""
    bblk = _choose_bblk(batch)
    nimg = 2 * bblk
    nsteps = batch // bblk

    kw = _kernel_weights(params)
    consts = dict(
        kw,
        ma=jnp.asarray(_interior_mask_np(H_IN, W_IN, NPAD_A, nimg)),
        mb=jnp.asarray(_interior_mask_np(H_B, W_B, NPAD_B, nimg)),
        s1=jnp.asarray(_pool_select_np(H_IN, W_IN, NPAD_A, NPAD_B, nimg), jnp.bfloat16),
        s2=jnp.asarray(_pool_select_np(H_B, W_B, NPAD_B, NPAD_C, nimg), jnp.bfloat16),
        s3=jnp.asarray(_pool_select_last_np(H_C, W_C, NPAD_C, nimg), jnp.bfloat16),
    )
    order = ["w1", "b1", "w2", "b2", "w3", "b3", "w4", "b4", "w5", "b5",
             "ma", "mb", "s1", "s2", "s3", "wfc", "bfc", "wmu", "bmu"]
    const_arrays = [consts[k] for k in order]

    kernel = _make_kernel(nimg, bblk, _roll_sign())
    la = nimg * NPAD_A

    x_spec = pl.BlockSpec((1, CIN_PAD, la), lambda b: (b, 0, 0))
    const_specs = [pl.BlockSpec(tuple(a.shape), lambda b: (0, 0)) for a in const_arrays]

    call = pl.pallas_call(
        kernel,
        out_shape=jax.ShapeDtypeStruct((nsteps, bblk, ZDIM), jnp.float32),
        grid_spec=pltpu.PrefetchScalarGridSpec(
            num_scalar_prefetch=0,
            grid=(nsteps,),                        # bblk (x1, x2) pairs per step
            in_specs=[x_spec] + const_specs,
            out_specs=pl.BlockSpec((1, bblk, ZDIM), lambda b: (b, 0, 0)),
        ),
        compiler_params=pltpu.CompilerParams(
            dimension_semantics=("parallel",),
            vmem_limit_bytes=32 * 1024 * 1024,
        ),
    )

    def fwd(x1, x2):
        def prep(x):   # NCHW -> zero-padded, flattened spatial, lane/channel padded, per image
            xp = jnp.pad(x.astype(jnp.float32),
                         ((0, 0), (0, CIN_PAD - CIN), (1, 1), (1, 1)))
            xf = xp.reshape(batch, CIN_PAD, N_A)
            return jnp.pad(xf, ((0, 0), (0, 0), (0, NPAD_A - N_A)))

        xs = jnp.stack([prep(x1), prep(x2)], axis=1)            # (B, 2, CIN_PAD, NPAD_A)
        xs = xs.reshape(nsteps, nimg, CIN_PAD, NPAD_A)
        xs = jnp.transpose(xs, (0, 2, 1, 3)).reshape(nsteps, CIN_PAD, nimg * NPAD_A)
        out = call(xs.astype(jnp.bfloat16), *const_arrays)
        return out.reshape(batch, ZDIM)

    return jax.jit(fwd)


# ------------------------- pure-JAX reference (check) --------------------------

def _ref_forward(x1, x2, p):
    def conv(h, w, b):
        y = lax.conv_general_dilated(h, w, (1, 1), [(1, 1), (1, 1)],
                                     dimension_numbers=("NCHW", "OIHW", "NCHW"))
        return y + b.reshape(1, -1, 1, 1)

    def maxpool(h):
        n, c, hh, ww = h.shape
        return h.reshape(n, c, hh // 2, 2, ww // 2, 2).max(axis=(3, 5))

    def features(x):
        h = jax.nn.relu(conv(x, p["w1"], p["b1"]))
        h = jax.nn.relu(conv(h, p["w2"], p["b2"]))
        h = maxpool(h)
        h = jax.nn.relu(conv(h, p["w3"], p["b3"]))
        h = jax.nn.relu(conv(h, p["w4"], p["b4"]))
        h = maxpool(h)
        h = jax.nn.relu(conv(h, p["w5"], p["b5"]))    # model_bn_share stand-in
        return maxpool(h)                              # (B, C3, 2, 2)

    def head(h):
        b = h.shape[0]
        f = h.reshape(b, -1)                           # PyTorch .view(B, -1) order
        f = jax.nn.relu(f @ p["wfc"].T + p["bfc"])     # model_bn2 stand-in
        return f @ p["wmu"].T + p["bmu"]               # mu (1x1 conv == Linear)

    g1 = head(features(x1))
    g2 = head(features(x2))
    return (g1 - g2) ** 2


# ----------------------------------- main ---------------------------------------

if __name__ == "__main__":
    key = jax.random.PRNGKey(0)
    kx1, kx2, kp = jax.random.split(key, 3)

    B = 2
    x1 = jax.random.normal(kx1, (B, CIN, H_IN, W_IN), jnp.float32)
    x2 = jax.random.normal(kx2, (B, CIN, H_IN, W_IN), jnp.float32)
    params = init_params(kp)

    relation_forward = make_relation_forward(params, B)
    out = jax.block_until_ready(relation_forward(x1, x2))
    ref = _ref_forward(x1, x2, params)

    assert out.shape == (B, ZDIM)
    # bf16 MXU-operand rounding exists in both the kernel and the XLA reference path.
    assert bool(jnp.allclose(out, ref, atol=5e-2, rtol=5e-2))

    print("KERNEL_OK")
</pallas_src>

<mosaic_0001>
module attributes {stable_mosaic.version = 11 : i64} {
  func.func @probe(%arg0: memref<8x128xf32, #tpu.memory_space<vmem>>, %arg1: memref<8x128xf32, #tpu.memory_space<vmem>>) attributes {dimension_semantics = [], scalar_prefetch = 0 : i64, scratch_operands = 0 : i64, tpu.core_type = #tpu.core_type<tc>} {
    %c0 = arith.constant 0 : index
    %c0_0 = arith.constant 0 : index
    %0 = vector.load %arg0[%c0, %c0_0] : memref<8x128xf32, #tpu.memory_space<vmem>>, vector<8x128xf32>
    %c1_i32 = arith.constant 1 : i32
    %1 = tpu.dynamic_rotate %0 by %c1_i32 dim 1 : vector<8x128xf32>, i32 -> vector<8x128xf32>
    %c0_1 = arith.constant 0 : index
    %c0_2 = arith.constant 0 : index
    %2 = vector.load %arg1[%c0_1, %c0_2] : memref<8x128xf32, #tpu.memory_space<vmem>>, vector<8x128xf32>
    tpu.vector_store %arg1[%c0_1, %c0_2], %1 {strides = array<i32>} : memref<8x128xf32, #tpu.memory_space<vmem>>, vector<8x128xf32>,
    return
  }
}

</mosaic_0001>

<bundles_post_ra>
// kernel: tpu_custom_call.1
= control target key start
LH: loop header
LB: loop body
LE: loop exit
PB: predicated region body
PF: predicated region fallthrough
CT: control target
= control target key end

     0   :  { %6 = vsyncpa [#allocation3], 0  ;;  %s106_s0 = inlined_call_operand.hbm [shape: f32[8,128], index: 0, kind: input, shape index: {}]   ;;  %s107_s1 = inlined_call_operand.hbm [shape: f32[8,128], index: 1, kind: output, shape index: {}]  }
   0x1   :  { %7 = vsyncpa [#allocation4], 0  ;;  %s87_s6 = smov [#allocation2]  }
   0x2   :  { %s14_s7 = sshll.u32 %s87_s6, 4  ;;  %s15_s7 = int_to_ptr.vmem [resolvable:$true] %s14_s7 }
   0x3   :  { %s51_s8 = scalar_lea.vmem %s15_s7, 128  ;;  %p56_p1 = scmp.lt.s32.totalorder %s15_s7, %s15_s7 }
   0x4   :  { %p52_p0 = scmp.ne.s32.totalorder %s15_s7, %s51_s8  ;;  %p57_p2 = scmp.lt.s32.totalorder %s51_s8, %s51_s8 }
   0x6   :  { %p58_p3 = por %p57_p2, %p56_p1 }
   0x8   :  { %p59_p4 = pnand %p58_p3, %p52_p0 }
   0xa   :  { %62 = shalt.err (!%p59_p4)
}
   0xb   :  { %17 = dma.hbm_to_vmem [thread:$0]  %s106_s0, 128, %s15_s7, [#allocation3]  }
   0xc   :  { %83 = dma.done.wait [#allocation3], 128  }
   0xd   :  { %84 = vsyncadd [#allocation3], 4294967168  ;;  %v21_v0 = vld [vmem:[#allocation2] sm:$0xff]  ;;  %s88_s11 = smov 1   ;;  %s89_s12 = smov [#allocation5]  }
   0xe   :  { %22 = vrot.lane.b32.xlu0 %v21_v0, %s88_s11  ;;  %s31_s13 = sshll.u32 %s89_s12, 4  ;;  %s32_s13 = int_to_ptr.vmem [resolvable:$true] %s31_s13 }
   0xf   :  { %s63_s14 = scalar_lea.vmem %s32_s13, 128  ;;  %p68_p6 = scmp.lt.s32.totalorder %s32_s13, %s32_s13 }
  0x10   :  { %p64_p5 = scmp.ne.s32.totalorder %s32_s13, %s63_s14  ;;  %p69_p7 = scmp.lt.s32.totalorder %s63_s14, %s63_s14 }
  0x12   :  { %p70_p8 = por %p69_p7, %p68_p6 }
  0x14   :  { %p71_p9 = pnand %p70_p8, %p64_p5 }
  0x80   :  { %v23_v1 = vpop.permute.xlu0 %22 }
  0x81   :  { %24 = vst [vmem:[#allocation5] sm:$0xff] %v23_v1 }
  0x82   :  { %74 = shalt.err (!%p71_p9)
}
  0x83   :  { %34 = dma.vmem_to_hbm [thread:$0]  %s32_s13, 128, %s107_s1, [#allocation4]  }
  0x84   :  { %85 = dma.done.wait [#allocation4], 128  }
  0x85   :  { %86 = vsyncadd [#allocation4], 4294967168 }
  0x86   :  { %38 = vsyncpa [#allocation3], 1 }
  0x87   :  { %39 = vsyncpa [#allocation4], 1 }

</bundles_post_ra>
